<compile_context>
chip_gen: v6e
topology: v6e:2x2x1
jax: 0.10.0
libtpu: 0.0.40
codegen_flags: <defaults>
</compile_context>

<pallas_src>
import functools
import numpy as np
import jax
import jax.numpy as jnp
from jax.experimental import pallas as pl
from jax.experimental.pallas import tpu as pltpu


def _round_up(x, m):
    return (x + m - 1) // m * m


# ----------------------------------------------------------------------------
# Pallas kernels
# ----------------------------------------------------------------------------
def _fused_matmul_kernel(*refs, relu, has_res):
    """Tiled Y = X @ W with K-reduction accumulator; epilogue only at k==last:
    Y = acc*scale + shift [+ residual] [ReLU]."""
    if has_res:
        x_ref, w_ref, s_ref, b_ref, r_ref, o_ref, acc_ref = refs
    else:
        x_ref, w_ref, s_ref, b_ref, o_ref, acc_ref = refs
        r_ref = None

    @pl.when(pl.program_id(2) == 0)
    def _init():
        acc_ref[...] = jnp.zeros_like(acc_ref)

    # Inner reduction step: pure MXU accumulate (bf16 in, f32 acc).
    acc_ref[...] += jnp.dot(x_ref[...], w_ref[...],
                            preferred_element_type=jnp.float32)

    @pl.when(pl.program_id(2) == pl.num_programs(2) - 1)
    def _finalize():
        y = acc_ref[...] * s_ref[...] + b_ref[...]
        if has_res:
            y = y + r_ref[...].astype(jnp.float32)
        if relu:
            y = jnp.maximum(y, 0.0)
        o_ref[...] = y.astype(o_ref.dtype)


def _maxpool_kernel(x_ref, o_ref):
    """Elementwise max over the leading (window) axis of a [9, TM, C] tile."""
    m = x_ref[0]
    for k in range(1, x_ref.shape[0]):
        m = jnp.maximum(m, x_ref[k])
    o_ref[...] = m


def _avgpool_kernel(x_ref, o_ref, *, inv_hw):
    """[1, HW, C] -> [1, 1, C] mean over the spatial axis (f32 accumulate)."""
    o_ref[...] = jnp.sum(x_ref[...].astype(jnp.float32), axis=1,
                         keepdims=True) * inv_hw


# ----------------------------------------------------------------------------
# Tile selection helpers (static shapes only)
# ----------------------------------------------------------------------------
def _pick_m_tile(m):
    if m <= 512:
        return m, m                       # single M block, no padding needed
    for c in (256, 128, 64, 32, 16):
        if m % c == 0:
            return c, m
    return 256, _round_up(m, 256)


def _pick_div(dim, pref):
    # dim is a multiple of 128 by construction.
    for c in (pref, 256, 128):
        if c <= dim and dim % c == 0:
            return c
    return min(dim, 128)


def _pick_pool_tile(m):
    if m <= 1024:
        return m, m
    for c in (1024, 512, 256, 128, 64, 32, 16):
        if m % c == 0:
            return c, m
    return 512, _round_up(m, 512)


# ----------------------------------------------------------------------------
# Fused tiled matmul wrapper (called inside jitted layer wrappers)
# ----------------------------------------------------------------------------
def _fused_matmul(x, wmat, scale, shift, residual, relu, out_dtype):
    """x:[M,K] bf16, wmat:[Kp,Np] bf16 (pre-padded), scale/shift:[1,Np] f32,
    residual:[M,Np] bf16 or None.  Returns [M,Np] out_dtype."""
    m, k = x.shape
    kp, np_ = wmat.shape
    if k < kp:
        x = jnp.pad(x, ((0, 0), (0, kp - k)))
    tm, mp = _pick_m_tile(m)
    if mp > m:
        x = jnp.pad(x, ((0, mp - m), (0, 0)))
        if residual is not None:
            residual = jnp.pad(residual, ((0, mp - m), (0, 0)))
    tn = _pick_div(np_, 256)
    tk = _pick_div(kp, 512)
    grid = (mp // tm, np_ // tn, kp // tk)

    has_res = residual is not None
    in_specs = [
        pl.BlockSpec((tm, tk), lambda i, j, kk: (i, kk)),
        pl.BlockSpec((tk, tn), lambda i, j, kk: (kk, j)),
        pl.BlockSpec((1, tn), lambda i, j, kk: (0, j)),
        pl.BlockSpec((1, tn), lambda i, j, kk: (0, j)),
    ]
    args = [x, wmat, scale, shift]
    if has_res:
        in_specs.append(pl.BlockSpec((tm, tn), lambda i, j, kk: (i, j)))
        args.append(residual)

    grid_spec = pltpu.PrefetchScalarGridSpec(
        num_scalar_prefetch=0,
        grid=grid,
        in_specs=in_specs,
        out_specs=pl.BlockSpec((tm, tn), lambda i, j, kk: (i, j)),
        scratch_shapes=[pltpu.VMEM((tm, tn), jnp.float32)],
    )
    out = pl.pallas_call(
        functools.partial(_fused_matmul_kernel, relu=relu, has_res=has_res),
        out_shape=jax.ShapeDtypeStruct((mp, np_), out_dtype),
        grid_spec=grid_spec,
        compiler_params=pltpu.CompilerParams(
            dimension_semantics=("parallel", "parallel", "arbitrary"),
            vmem_limit_bytes=32 * 1024 * 1024,
        ),
    )(*args)
    if mp > m:
        out = out[:m]
    return out


# ----------------------------------------------------------------------------
# Layer wrappers (jitted once per distinct shape/config)
# ----------------------------------------------------------------------------
def _im2col(x, kh, kw, stride, pad):
    n, h, w, c = x.shape
    if pad:
        x = jnp.pad(x, ((0, 0), (pad, pad), (pad, pad), (0, 0)))
    hp, wp = h + 2 * pad, w + 2 * pad
    ho = (hp - kh) // stride + 1
    wo = (wp - kw) // stride + 1
    patches = []
    for i in range(kh):
        for j in range(kw):
            patches.append(
                x[:, i:i + (ho - 1) * stride + 1:stride,
                  j:j + (wo - 1) * stride + 1:stride, :])
    cols = jnp.stack(patches, axis=3)                 # [N, Ho, Wo, kh*kw, C]
    return cols.reshape(n * ho * wo, kh * kw * c), (n, ho, wo)


@functools.partial(jax.jit,
                   static_argnames=("kh", "kw", "stride", "padding", "relu"))
def _conv_bn_jit(x, wmat, scale, shift, residual, *, kh, kw, stride, padding,
                 relu):
    """conv (no bias) + folded BN + optional residual + optional ReLU."""
    n, h, w, c = x.shape
    if kh == 1 and kw == 1:
        if stride > 1:
            x = x[:, ::stride, ::stride, :]
        n, ho, wo, _ = x.shape
        cols = x.reshape(n * ho * wo, x.shape[-1])
    else:
        cols, (n, ho, wo) = _im2col(x, kh, kw, stride, padding)
    res2d = None
    if residual is not None:
        res2d = residual.reshape(n * ho * wo, residual.shape[-1])
    y = _fused_matmul(cols, wmat, scale, shift, res2d, relu, jnp.bfloat16)
    return y.reshape(n, ho, wo, wmat.shape[1])


@jax.jit
def _maxpool_jit(x):                                   # 3x3 / stride 2 / pad 1
    n, h, w, c = x.shape
    xp = jnp.pad(x, ((0, 0), (1, 1), (1, 1), (0, 0)),
                 constant_values=-jnp.inf)
    ho = (h + 2 - 3) // 2 + 1
    wo = (w + 2 - 3) // 2 + 1
    m = n * ho * wo
    slices = []
    for i in range(3):
        for j in range(3):
            slices.append(
                xp[:, i:i + (ho - 1) * 2 + 1:2,
                   j:j + (wo - 1) * 2 + 1:2, :].reshape(m, c))
    stacked = jnp.stack(slices, axis=0)                # [9, M, C]
    tm, mp = _pick_pool_tile(m)
    if mp > m:
        stacked = jnp.pad(stacked, ((0, 0), (0, mp - m), (0, 0)))
    out = pl.pallas_call(
        _maxpool_kernel,
        out_shape=jax.ShapeDtypeStruct((mp, c), x.dtype),
        grid=(mp // tm,),
        in_specs=[pl.BlockSpec((9, tm, c), lambda i: (0, i, 0))],
        out_specs=pl.BlockSpec((tm, c), lambda i: (i, 0)),
        compiler_params=pltpu.CompilerParams(
            dimension_semantics=("parallel",)),
    )(stacked)
    if mp > m:
        out = out[:m]
    return out.reshape(n, ho, wo, c)


@jax.jit
def _avgpool_jit(x):                                   # [N,H,W,C] -> [N,C] f32
    n, h, w, c = x.shape
    hw = h * w
    x3 = x.reshape(n, hw, c)
    out = pl.pallas_call(
        functools.partial(_avgpool_kernel, inv_hw=1.0 / hw),
        out_shape=jax.ShapeDtypeStruct((n, 1, c), jnp.float32),
        grid=(n,),
        in_specs=[pl.BlockSpec((1, hw, c), lambda b: (b, 0, 0))],
        out_specs=pl.BlockSpec((1, 1, c), lambda b: (b, 0, 0)),
        compiler_params=pltpu.CompilerParams(
            dimension_semantics=("parallel",)),
    )(x3)
    return out.reshape(n, c)


@functools.partial(jax.jit, static_argnames=("n_out",))
def _fc_jit(pooled, w, scale, shift, *, n_out):
    y = _fused_matmul(pooled.astype(jnp.bfloat16), w, scale, shift, None,
                      relu=False, out_dtype=jnp.float32)
    return y[:, :n_out]


@functools.partial(jax.jit, static_argnames=("c_true",))
def _flatten_nchw(x_nhwc, *, c_true=None):
    # Matches PyTorch x.view(x.size(0), -1) on NCHW tensors.
    x = x_nhwc
    if c_true is not None and c_true != x.shape[-1]:
        x = x[..., :c_true]
    n = x.shape[0]
    return jnp.transpose(x, (0, 3, 1, 2)).reshape(n, -1).astype(jnp.float32)


# ----------------------------------------------------------------------------
# Deterministic synthetic ResNet152 parameters (pre-padded, bf16 weights)
# ----------------------------------------------------------------------------
_rng = np.random.default_rng(0)
_BN_EPS = 1e-5


def _conv_w_mat(kh, kw, cin, cout, cin_pad=None):
    fan_in = kh * kw * cin
    w = _rng.normal(0.0, np.sqrt(2.0 / fan_in),
                    (kh, kw, cin, cout)).astype(np.float32)
    cout_p = _round_up(cout, 128)
    if cin_pad is None:                       # stem: pad flattened K instead
        mat = w.reshape(kh * kw * cin, cout)
        kp = _round_up(mat.shape[0], 128)
        mat = np.pad(mat, ((0, kp - mat.shape[0]), (0, cout_p - cout)))
    else:                                     # per-tap channel padding
        w = np.pad(w, ((0, 0), (0, 0), (0, cin_pad - cin),
                       (0, cout_p - cout)))
        mat = w.reshape(kh * kw * cin_pad, cout_p)
    return jnp.asarray(mat, dtype=jnp.bfloat16)


def _bn_params(c):
    gamma = _rng.normal(1.0, 0.05, c).astype(np.float32)
    beta = _rng.normal(0.0, 0.05, c).astype(np.float32)
    mean = _rng.normal(0.0, 0.05, c).astype(np.float32)
    var = np.abs(_rng.normal(1.0, 0.05, c)).astype(np.float32)
    scale = gamma / np.sqrt(var + _BN_EPS)
    shift = beta - mean * scale
    cp = _round_up(c, 128)
    scale = np.pad(scale, (0, cp - c)).reshape(1, cp)
    shift = np.pad(shift, (0, cp - c)).reshape(1, cp)
    return jnp.asarray(scale, jnp.float32), jnp.asarray(shift, jnp.float32)


def build_resnet152_params():
    params = {"stem_w": _conv_w_mat(7, 7, 3, 64, cin_pad=None),
              "stem_bn": _bn_params(64)}
    # ResNet-152 stages: (num bottleneck blocks, mid channels, stride)
    stage_defs = [(3, 64, 1), (8, 128, 2), (36, 256, 2), (3, 512, 2)]
    in_c = 64
    stages = []
    for n_blocks, mid, stride in stage_defs:
        blocks = []
        for b in range(n_blocks):
            s = stride if b == 0 else 1
            out_c = mid * 4
            blk = {
                "w1": _conv_w_mat(1, 1, in_c, mid, cin_pad=_round_up(in_c, 128)),
                "bn1": _bn_params(mid),
                "w2": _conv_w_mat(3, 3, mid, mid, cin_pad=_round_up(mid, 128)),
                "bn2": _bn_params(mid),
                "w3": _conv_w_mat(1, 1, mid, out_c, cin_pad=_round_up(mid, 128)),
                "bn3": _bn_params(out_c),
                "stride": s,
            }
            if s != 1 or in_c != out_c:
                blk["wd"] = _conv_w_mat(1, 1, in_c, out_c,
                                        cin_pad=_round_up(in_c, 128))
                blk["bnd"] = _bn_params(out_c)
            blocks.append(blk)
            in_c = out_c
        stages.append(blocks)
    params["stages"] = stages

    fc_w = _rng.normal(0.0, 0.01, (2048, 1000)).astype(np.float32)
    fc_b = _rng.normal(0.0, 0.01, (1000,)).astype(np.float32)
    params["fc_w"] = jnp.asarray(np.pad(fc_w, ((0, 0), (0, 24))), jnp.bfloat16)
    params["fc_scale"] = jnp.asarray(
        np.pad(np.ones(1000, np.float32), (0, 24)).reshape(1, 1024))
    params["fc_shift"] = jnp.asarray(np.pad(fc_b, (0, 24)).reshape(1, 1024))
    return params


# ----------------------------------------------------------------------------
# Forward pass
# ----------------------------------------------------------------------------
def _bottleneck(x, blk):
    s = blk["stride"]
    if "wd" in blk:
        identity = _conv_bn_jit(x, blk["wd"], *blk["bnd"], None,
                                kh=1, kw=1, stride=s, padding=0, relu=False)
    else:
        identity = x
    out = _conv_bn_jit(x, blk["w1"], *blk["bn1"], None,
                       kh=1, kw=1, stride=1, padding=0, relu=True)
    out = _conv_bn_jit(out, blk["w2"], *blk["bn2"], None,
                       kh=3, kw=3, stride=s, padding=1, relu=True)
    out = _conv_bn_jit(out, blk["w3"], *blk["bn3"], identity,
                       kh=1, kw=1, stride=1, padding=0, relu=True)
    return out


def resnet152_embeddings(params, x_nchw, layer_index=-1):
    assert -1 <= layer_index < 7
    x = jnp.transpose(x_nchw, (0, 2, 3, 1)).astype(jnp.bfloat16)  # NCHW->NHWC
    # Layer 0: conv7x7/s2 + BN + ReLU + maxpool3x3/s2
    x = _conv_bn_jit(x, params["stem_w"], *params["stem_bn"], None,
                     kh=7, kw=7, stride=2, padding=3, relu=True)
    x = _maxpool_jit(x)
    outs = [_flatten_nchw(x, c_true=64)]
    if layer_index == 0:
        return [outs[0]]
    # Layers 1-4: bottleneck stacks
    for si, blocks in enumerate(params["stages"]):
        for blk in blocks:
            x = _bottleneck(x, blk)
        outs.append(_flatten_nchw(x))
        if layer_index == si + 1:
            return [outs[-1]]
    # Layer 5: adaptive average pool to 1x1, flattened
    pooled = _avgpool_jit(x)                           # [N, 2048] f32
    outs.append(pooled)
    if layer_index == 5:
        return [pooled]
    # Layer 6: fully connected.
    # TODO(synk): the PyTorch module applies nn.Linear directly to the
    # unflattened [N, 2048, 1, 1] avgpool output (which would raise a shape
    # error); we implement the intended semantics (flatten then Linear).
    logits = _fc_jit(pooled, params["fc_w"], params["fc_scale"],
                     params["fc_shift"], n_out=1000)
    outs.append(logits)
    if layer_index == 6:
        return [logits]
    return outs


# ----------------------------------------------------------------------------
if __name__ == "__main__":
    params = build_resnet152_params()
    key = jax.random.PRNGKey(0)
    # Small NCHW input (PyTorch convention): batch=2, 3 channels, 64x64.
    x = jax.random.normal(key, (2, 3, 64, 64), dtype=jnp.float32)

    embeddings = resnet152_embeddings(params, x, layer_index=-1)
    for e in embeddings:
        jax.block_until_ready(e)

    expected_shapes = [
        (2, 64 * 16 * 16), (2, 256 * 16 * 16), (2, 512 * 8 * 8),
        (2, 1024 * 4 * 4), (2, 2048 * 2 * 2), (2, 2048), (2, 1000),
    ]
    assert len(embeddings) == 7
    for e, s in zip(embeddings, expected_shapes):
        assert tuple(e.shape) == s, (e.shape, s)
        assert e.dtype == jnp.float32

    print("KERNEL_OK")
</pallas_src>

<mosaic_0001>
module attributes {stable_mosaic.version = 11 : i64} {
  func.func @_fused_matmul_kernel(%arg0: i32, %arg1: i32, %arg2: i32, %arg3: memref<256x256xbf16, #tpu.memory_space<vmem>>, %arg4: memref<256x128xbf16, #tpu.memory_space<vmem>>, %arg5: memref<1x128xf32, #tpu.memory_space<vmem>>, %arg6: memref<1x128xf32, #tpu.memory_space<vmem>>, %arg7: memref<256x128xbf16, #tpu.memory_space<vmem>>, %arg8: memref<256x128xf32, #tpu.memory_space<vmem>>) attributes {dimension_semantics = [#tpu.dimension_semantics<parallel>, #tpu.dimension_semantics<parallel>, #tpu.dimension_semantics<arbitrary>], iteration_bounds = array<i64: 8, 1, 1>, scalar_prefetch = 0 : i64, scratch_operands = 1 : i64, tpu.core_type = #tpu.core_type<tc>, window_params = [{transform_indices = @transform_0, window_bounds = array<i64: 256, 256>}, {transform_indices = @transform_1, window_bounds = array<i64: 256, 128>}, {transform_indices = @transform_2, window_bounds = array<i64: 1, 128>}, {transform_indices = @transform_3, window_bounds = array<i64: 1, 128>}, {transform_indices = @transform_4, window_bounds = array<i64: 256, 128>}]} {
    %c0_i32 = arith.constant 0 : i32
    %0 = arith.cmpi eq, %arg2, %c0_i32 : i32
    %1 = arith.extui %0 : i1 to i32
    %c0_i32_0 = arith.constant 0 : i32
    %2 = arith.cmpi ne, %1, %c0_i32_0 : i32
    scf.if %2 {
      %cst_10 = arith.constant 0.000000e+00 : f32
      %12 = vector.broadcast %cst_10 : f32 to vector<256x128xf32>
      %c0_11 = arith.constant 0 : index
      %c0_12 = arith.constant 0 : index
      %13 = vector.load %arg8[%c0_11, %c0_12] : memref<256x128xf32, #tpu.memory_space<vmem>>, vector<256x128xf32>
      tpu.vector_store %arg8[%c0_11, %c0_12], %12 {strides = array<i32>} : memref<256x128xf32, #tpu.memory_space<vmem>>, vector<256x128xf32>,
    } else {
    }
    %c0 = arith.constant 0 : index
    %c0_1 = arith.constant 0 : index
    %3 = vector.load %arg8[%c0, %c0_1] : memref<256x128xf32, #tpu.memory_space<vmem>>, vector<256x128xf32>
    %c0_2 = arith.constant 0 : index
    %c0_3 = arith.constant 0 : index
    %4 = vector.load %arg3[%c0_2, %c0_3] : memref<256x256xbf16, #tpu.memory_space<vmem>>, vector<256x256xbf16>
    %c0_4 = arith.constant 0 : index
    %c0_5 = arith.constant 0 : index
    %5 = vector.load %arg4[%c0_4, %c0_5] : memref<256x128xbf16, #tpu.memory_space<vmem>>, vector<256x128xbf16>
    %cst = arith.constant dense<0.000000e+00> : vector<256x128xf32>
    %6 = tpu.matmul %4, %5, %cst {dimension_numbers = #tpu.dot_dimension_numbers<[1], [0], [0], [1], [0, 0, 1, 1], [], []>} : vector<256x256xbf16>, vector<256x128xbf16>, vector<256x128xf32> -> vector<256x128xf32>
    %7 = arith.addf %3, %6 : vector<256x128xf32>
    %c0_6 = arith.constant 0 : index
    %c0_7 = arith.constant 0 : index
    %8 = vector.load %arg8[%c0_6, %c0_7] : memref<256x128xf32, #tpu.memory_space<vmem>>, vector<256x128xf32>
    tpu.vector_store %arg8[%c0_6, %c0_7], %7 {strides = array<i32>} : memref<256x128xf32, #tpu.memory_space<vmem>>, vector<256x128xf32>,
    %c0_i32_8 = arith.constant 0 : i32
    %9 = arith.cmpi eq, %arg2, %c0_i32_8 : i32
    %10 = arith.extui %9 : i1 to i32
    %c0_i32_9 = arith.constant 0 : i32
    %11 = arith.cmpi ne, %10, %c0_i32_9 : i32
    scf.if %11 {
      %c0_10 = arith.constant 0 : index
      %c0_11 = arith.constant 0 : index
      %12 = vector.load %arg8[%c0_10, %c0_11] : memref<256x128xf32, #tpu.memory_space<vmem>>, vector<256x128xf32>
      %c0_12 = arith.constant 0 : index
      %c0_13 = arith.constant 0 : index
      %13 = vector.load %arg5[%c0_12, %c0_13] : memref<1x128xf32, #tpu.memory_space<vmem>>, vector<1x128xf32>
      %14 = vector.broadcast %13 : vector<1x128xf32> to vector<256x128xf32>
      %15 = arith.mulf %12, %14 : vector<256x128xf32>
      %c0_14 = arith.constant 0 : index
      %c0_15 = arith.constant 0 : index
      %16 = vector.load %arg6[%c0_14, %c0_15] : memref<1x128xf32, #tpu.memory_space<vmem>>, vector<1x128xf32>
      %17 = vector.broadcast %16 : vector<1x128xf32> to vector<256x128xf32>
      %18 = arith.addf %15, %17 : vector<256x128xf32>
      %cst_16 = arith.constant 0.000000e+00 : f32
      %19 = vector.broadcast %cst_16 : f32 to vector<256x128xf32>
      %20 = arith.maximumf %18, %19 : vector<256x128xf32>
      %21 = arith.truncf %20 : vector<256x128xf32> to vector<256x128xbf16>
      %c0_17 = arith.constant 0 : index
      %c0_18 = arith.constant 0 : index
      %22 = vector.load %arg7[%c0_17, %c0_18] : memref<256x128xbf16, #tpu.memory_space<vmem>>, vector<256x128xbf16>
      tpu.vector_store %arg7[%c0_17, %c0_18], %21 {strides = array<i32>} : memref<256x128xbf16, #tpu.memory_space<vmem>>, vector<256x128xbf16>,
    } else {
    }
    return
  }
  func.func @transform_0(%arg0: i32, %arg1: i32, %arg2: i32) -> (i32, i32) {
    %c0_i32 = arith.constant 0 : i32
    return %arg0, %arg2 : i32, i32
  }
  func.func @transform_1(%arg0: i32, %arg1: i32, %arg2: i32) -> (i32, i32) {
    %c0_i32 = arith.constant 0 : i32
    return %arg2, %arg1 : i32, i32
  }
  func.func @transform_2(%arg0: i32, %arg1: i32, %arg2: i32) -> (i32, i32) {
    %c0_i32 = arith.constant 0 : i32
    %c0_i32_0 = arith.constant 0 : i32
    return %c0_i32, %arg1 : i32, i32
  }
  func.func @transform_3(%arg0: i32, %arg1: i32, %arg2: i32) -> (i32, i32) {
    %c0_i32 = arith.constant 0 : i32
    %c0_i32_0 = arith.constant 0 : i32
    return %c0_i32, %arg1 : i32, i32
  }
  func.func @transform_4(%arg0: i32, %arg1: i32, %arg2: i32) -> (i32, i32) {
    %c0_i32 = arith.constant 0 : i32
    return %arg0, %arg1 : i32, i32
  }
}

</mosaic_0001>

<bundles_post_ra>
// kernel: _conv_bn_jit.1
= control target key start
LH: loop header
LB: loop body
LE: loop exit
PB: predicated region body
PF: predicated region fallthrough
CT: control target
= control target key end

     0   :  { %9 = vsyncpa [#allocation4], 0  ;;  %s2232_s0 = inlined_call_operand.vmem [shape: bf16[2048,256], index: 0, kind: input, shape index: {}]   ;;  %s2233_s1 = inlined_call_operand.vmem [shape: bf16[256,128], index: 1, kind: input, shape index: {}]   ;;  %s2234_s2 = inlined_call_operand.vmem [shape: f32[1,128], index: 2, kind: input, shape index: {}]   ;;  %s2235_s3 = inlined_call_operand.vmem [shape: f32[1,128], index: 3, kind: input, shape index: {}]   ;;  %s2236_s4 = inlined_call_operand.hbm [shape: bf16[2048,128], index: 4, kind: output, shape index: {}]  }
   0x1   :  { %11 = vsyncpa [#allocation4 + $0x1], 0  ;;  %s1940_s15 = smov 0   ;;  %s1942_s16 = smov 0  }
   0x2   :  { %s1944_s17 = smov 0   ;;  %s1946_s18 = smov 0  }
   0x3   :  { %s1948_s19 = smov 0   ;;  %s1950_s20 = smov 0  }
   0x4 LB: > { %s1357_s21 = sadd.s32 4294967295, %s1910_s20   ;;  %s1358_s22 = sadd.s32 4294967294, %s1910_s20   ;;  %s1910_s20 = sphi %s1950_s20, %s17_s20   ;;  %s1906_s19 = sphi %s1948_s19, %s2243_s19   ;;  %s1902_s18 = sphi %s1946_s18, %s2242_s18   ;;  %s1898_s17 = sphi %s1944_s17, %s2241_s17   ;;  %s1894_s16 = sphi %s1942_s16, %s2240_s16   ;;  %s1890_s15 = sphi %s1940_s15, %s2239_s15  }
   0x5   : > { %s36_s23 = sadd.s32 1, %s1906_s19  ;;  %s153_s24 = sadd.s32 1, %s1898_s17 }
   0x6   : > { %p38_p0 = scmp.ge.s32.totalorder %s36_s23, 8  ;;  %p163_p1 = scmp.ne.s32.totalorder %s1898_s17, %s1894_s16 }
   0x7   : > { %p164_p2 = scmp.eq.s32.totalorder %s1357_s21, 7  ;;  %p169_p3 = scmp.ne.s32.totalorder %s1894_s16, %s1890_s15 }
   0x8   : > { %s2245_s23 = smov (%p38_p0, %s36_s23), 0  ;;  %p170_p5 = scmp.eq.s32.totalorder %s1358_s22, 7 }
   0x9   : > { %p1980_p4 = por %p164_p2, %p163_p1  ;;  %s148_s26 = ssub.s32 %s1906_s19, %s2245_s23 }
   0xa   : > { %p1364_p6 = scmp.ge.s32.totalorder %s1910_s20, 1  ;;  %p151_p7 = scmp.eq.s32.totalorder %s148_s26, 0 }
   0xb   : > { %p1987_p8 = por %p170_p5, %p169_p3  ;;  %p227_p9 = scmp.lt.s32.totalorder %s1910_s20, 9 }
   0xc   : > { %s1993_s28 = scalar_select %p151_p7, %s1898_s17, %s153_s24  }
   0xd   : > { %p228_p10 = pnand %p1364_p6, %p227_p9 }
   0xe   : > { %s1366_s5 = sshll.u32 (!%p228_p10), %s1902_s18, 5  ;;  %s1489_s21 = sshll.u32 (!%p228_p10), %s1902_s18, 11 }
   0xf   : > { %231 = sbr.rel (%p228_p10) target bundleno = 332 (0x14c), region = 36  ;;  %p274_p11 = scmp.lt.s32.totalorder (!%p228_p10), %s1366_s5, 255 }
  0x10   : > { %s2179_s29 = scalar_lea.hbm (!%p228_p10), %s2236_s4, %s1489_s21  ;;  %s1912_s6 = smov (!%p228_p10), [#allocation3]  }
  0x11   : > { %s1838_s7 = sshll.u32 (!%p228_p10), %s1912_s6, 4  ;;  %s1839_s7 = int_to_ptr.vmem [resolvable:$false] %s1838_s7 }
  0x12   : > { %s1840_s8 = scalar_lea.vmem (!%p228_p10), %s1839_s7, 4096 }
  0x14   : > { %v1770_v0 = vld [vmem:[%s2233_s1 + $0x78] sm:$0xff]   ;;  %v1772_v2 = vld [vmem:[%s2233_s1 + $0x70] sm:$0xff]   ;;  %v1774_v4 = vld [vmem:[%s2233_s1 + $0x68] sm:$0xff]   ;;  %s2247_s5 = smov (!%p274_p11, %s1366_s5), 255 }
  0x15   : > { %v1771_v1 = vld [vmem:[%s2233_s1 + $0x38] sm:$0xff]   ;;  %1585 = vmatprep.subr.bf16.mxu0 %v1770_v0  ;;  %1697 = vmatprep.subr.bf16.mxu1 %v1770_v0  ;;  %v1773_v3 = vld [vmem:[%s2233_s1 + $0x30] sm:$0xff]   ;;  %v1775_v5 = vld [vmem:[%s2233_s1 + $0x28] sm:$0xff]   ;;  %s1456_s30 = sshll.u32 %s2247_s5, 3  ;;  %s269_s5 = sand.u32 1, %s1894_s16  }
  0x16   : > { %1586 = vmatpush3.bf16.msra.mxu0 %v1771_v1  ;;  %1705 = vmatpush3.bf16.msra.mxu1 %v1771_v1  ;;  %v1776_v6 = vld [vmem:[%s2233_s1 + $0x60] sm:$0xff]   ;;  %v1778_v8 = vld [vmem:[%s2233_s1 + $0x58] sm:$0xff]   ;;  %s2026_s10 = scalar_lea.vmem %s2232_s0, %s1456_s30  ;;  %v1780_v10 = vld [vmem:[%s2233_s1 + $0x50] sm:$0xff]   ;;  %s1365_s13 = sshll.u32 %s269_s5, 7 }
  0x17   : > { %1587 = vmatprep.subr.bf16.mxu0 %v1772_v2  ;;  %1698 = vmatprep.subr.bf16.mxu1 %v1772_v2  ;;  %v1777_v7 = vld [vmem:[%s2233_s1 + $0x20] sm:$0xff]   ;;  %v1779_v9 = vld [vmem:[%s2233_s1 + $0x18] sm:$0xff]   ;;  %v1781_v13 = vld [vmem:[%s2233_s1 + $0x10] sm:$0xff]   ;;  %s2104_s14 = scalar_lea.vmem [#allocation3], %s1365_s13  ;;  %s2187_s18 = scalar_lea.sflag [#allocation4], %s269_s5 }
  0x18   : > { %v1788_v11 = vld [vmem:[%s2026_s10 + $0x4] ss:$8 sps:$4 sm:$0xff]   ;;  %v1786_v18 = vld [vmem:[%s2026_s10] ss:$8 sps:$4 sm:$0xff]   ;;  %v1792_v20 = vld [vmem:[%s2026_s10 + $0x14] ss:$8 sps:$4 sm:$0xff]  }
  0x19   : > { %v1791_v12 = vld [vmem:[%s2026_s10 + $0x84] ss:$8 sps:$4 sm:$0xff]   ;;  %721 = vmatprep.mubr.bf16.mxu0 %v1788_v11  ;;  %v1789_v19 = vld [vmem:[%s2026_s10 + $0x80] ss:$8 sps:$4 sm:$0xff]   ;;  %v1794_v21 = vld [vmem:[%s2026_s10 + $0x94] ss:$8 sps:$4 sm:$0xff]  }
  0x1a   : > { %1588 = vmatpush3.bf16.msra.mxu0 %v1773_v3  ;;  %1706 = vmatpush3.bf16.msra.mxu1 %v1773_v3  ;;  %v1782_v14 = vld [vmem:[%s2233_s1 + $0x48] sm:$0xff]   ;;  %v1784_v16 = vld [vmem:[%s2233_s1 + $0x40] sm:$0xff]   ;;  %v1796_v22 = vld [vmem:[%s2026_s10 + $0x10] ss:$8 sps:$4 sm:$0xff]   ;;  %s1234_s22 = sshll.u32 %s2104_s14, 4  ;;  %s2181_s22 = int_to_ptr.vmem [resolvable:$true] %s1234_s22 }
  0x1b   : > { %1589 = vmatprep.subr.bf16.mxu0 %v1774_v4  ;;  %1699 = vmatprep.subr.bf16.mxu1 %v1774_v4  ;;  %v1783_v15 = vld [vmem:[%s2233_s1 + $0x8] sm:$0xff]   ;;  %v1785_v17 = vld [vmem:[%s2233_s1] sm:$0xff]   ;;  %v1797_v23 = vld [vmem:[%s2026_s10 + $0x90] ss:$8 sps:$4 sm:$0xff]   ;;  %s1834_s30 = scalar_lea.vmem %s2181_s22, 2048  ;;  %p1841_p1 = scmp.lt.s32.totalorder %s2181_s22, %s1839_s7 }
  0x1c   : > { %785 = vmatprep.mubr.bf16.mxu1 %v1791_v12  ;;  %v1798_v24 = vld [vmem:[%s2026_s10 + $0x24] ss:$8 sps:$4 sm:$0xff]   ;;  %v1802_v26 = vld [vmem:[%s2026_s10 + $0x20] ss:$8 sps:$4 sm:$0xff]   ;;  %v1804_v28 = vld [vmem:[%s2026_s10 + $0x34] ss:$8 sps:$4 sm:$0xff]   ;;  %p1835_p12 = scmp.ne.s32.totalorder %s2181_s22, %s1834_s30  ;;  %p1842_p2 = scmp.lt.s32.totalorder %s1840_s8, %s1834_s30 }
  0x1d   : > { %v1800_v25 = vld [vmem:[%s2026_s10 + $0xa4] ss:$8 sps:$4 sm:$0xff]   ;;  %v1803_v27 = vld [vmem:[%s2026_s10 + $0xa0] ss:$8 sps:$4 sm:$0xff]   ;;  %v1806_v29 = vld [vmem:[%s2026_s10 + $0xb4] ss:$8 sps:$4 sm:$0xff]  }
  0x1e   : > { %1590 = vmatpush3.bf16.msra.mxu0 %v1775_v5  ;;  %1707 = vmatpush3.bf16.msra.mxu1 %v1775_v5  ;;  %v1808_v30 = vld [vmem:[%s2026_s10 + $0x30] ss:$8 sps:$4 sm:$0xff]   ;;  %v1810_v32 = vld [vmem:[%s2026_s10 + $0x44] ss:$8 sps:$4 sm:$0xff]   ;;  %v1814_v34 = vld [vmem:[%s2026_s10 + $0x40] ss:$8 sps:$4 sm:$0xff]   ;;  %p1836_p13 = pnand %p1835_p12, %p1980_p4  ;;  %p1843_p3 = por %p1842_p2, %p1841_p1 }
  0x1f   : > { %1591 = vmatprep.subr.bf16.mxu0 %v1776_v6  ;;  %1700 = vmatprep.subr.bf16.mxu1 %v1776_v6  ;;  %v1809_v31 = vld [vmem:[%s2026_s10 + $0xb0] ss:$8 sps:$4 sm:$0xff]   ;;  %v1812_v33 = vld [vmem:[%s2026_s10 + $0xc4] ss:$8 sps:$4 sm:$0xff]   ;;  %v1815_v35 = vld [vmem:[%s2026_s10 + $0xc0] ss:$8 sps:$4 sm:$0xff]  }
  0x20   : > { %v1816_v36 = vld [vmem:[%s2026_s10 + $0x54] ss:$8 sps:$4 sm:$0xff]   ;;  %v1820_v38 = vld [vmem:[%s2026_s10 + $0x50] ss:$8 sps:$4 sm:$0xff]   ;;  %v1822_v40 = vld [vmem:[%s2026_s10 + $0x64] ss:$8 sps:$4 sm:$0xff]   ;;  %p1837_p0 = pneg %p1836_p13 }
  0x21   : > { %v1818_v37 = vld [vmem:[%s2026_s10 + $0xd4] ss:$8 sps:$4 sm:$0xff]   ;;  %v1821_v39 = vld [vmem:[%s2026_s10 + $0xd0] ss:$8 sps:$4 sm:$0xff]   ;;  %v1824_v41 = vld [vmem:[%s2026_s10 + $0xe4] ss:$8 sps:$4 sm:$0xff]  }
  0x22   : > { %1592 = vmatpush3.bf16.msra.mxu0 %v1777_v7  ;;  %1708 = vmatpush3.bf16.msra.mxu1 %v1777_v7  ;;  %v1826_v42 = vld [vmem:[%s2026_s10 + $0x60] ss:$8 sps:$4 sm:$0xff]   ;;  %v1828_v44 = vld [vmem:[%s2026_s10 + $0x74] ss:$8 sps:$4 sm:$0xff]   ;;  %v1832_v46 = vld [vmem:[%s2026_s10 + $0x70] ss:$8 sps:$4 sm:$0xff]   ;;  %p1844_p5 = pnand %p1843_p3, %p1837_p0 }
  0x23   : > { %1593 = vmatprep.subr.bf16.mxu0 %v1778_v8  ;;  %1701 = vmatprep.subr.bf16.mxu1 %v1778_v8  ;;  %v1827_v43 = vld [vmem:[%s2026_s10 + $0xe0] ss:$8 sps:$4 sm:$0xff]   ;;  %v1830_v45 = vld [vmem:[%s2026_s10 + $0xf4] ss:$8 sps:$4 sm:$0xff]   ;;  %v1833_v47 = vld [vmem:[%s2026_s10 + $0xf0] ss:$8 sps:$4 sm:$0xff]  }
  0x24   : > { %v2084_v51 = vld [vmem:[%s2234_s2] ss:$0 sm:$0xff] }
  0x25   : > { %v2091_v59 = vld [vmem:[%s2235_s3] ss:$0 sm:$0xff] }
  0x26   : > { %1594 = vmatpush3.bf16.msra.mxu0 %v1779_v9  ;;  %1709 = vmatpush3.bf16.msra.mxu1 %v1779_v9 }
  0x27   : > { %1595 = vmatprep.subr.bf16.mxu0 %v1780_v10  ;;  %1702 = vmatprep.subr.bf16.mxu1 %v1780_v10 }
  0x2a   : > { %1596 = vmatpush3.bf16.msra.mxu0 %v1781_v13  ;;  %1710 = vmatpush3.bf16.msra.mxu1 %v1781_v13 }
  0x2b   : > { %1597 = vmatprep.subr.bf16.mxu0 %v1782_v14  ;;  %1703 = vmatprep.subr.bf16.mxu1 %v1782_v14 }
  0x2e   : > { %1598 = vmatpush3.bf16.msra.mxu0 %v1783_v15  ;;  %1711 = vmatpush3.bf16.msra.mxu1 %v1783_v15 }
  0x2f   : > { %1599 = vmatprep.subr.bf16.mxu0 %v1784_v16  ;;  %1704 = vmatprep.subr.bf16.mxu1 %v1784_v16 }
  0x32   : > { %1600 = vmatpush3.bf16.msra.mxu0 %v1785_v17  ;;  %1712 = vmatpush3.bf16.msra.mxu1 %v1785_v17 }
  0x35   : > { %722 = vmatmul.mubr.bf16.vlgmr.msra.gmra.mxu0 %v1786_v18  ;;  %786 = vmatmul.mubr.bf16.vlgmr.msra.gmra.mxu1 %v1789_v19 }
  0x36   : > { %729 = vmatprep.mubr.bf16.mxu0 %v1792_v20  ;;  %793 = vmatprep.mubr.bf16.mxu1 %v1794_v21 }
  0x3d   : > { %730 = vmatmul.mubr.bf16.gmra.mxu0 %v1796_v22  ;;  %794 = vmatmul.mubr.bf16.gmra.mxu1 %v1797_v23 }
  0x3e   : > { %737 = vmatprep.mubr.bf16.mxu0 %v1798_v24  ;;  %801 = vmatprep.mubr.bf16.mxu1 %v1800_v25 }
  0x45   : > { %738 = vmatmul.mubr.bf16.gmra.mxu0 %v1802_v26  ;;  %802 = vmatmul.mubr.bf16.gmra.mxu1 %v1803_v27 }
  0x46   : > { %745 = vmatprep.mubr.bf16.mxu0 %v1804_v28  ;;  %809 = vmatprep.mubr.bf16.mxu1 %v1806_v29 }
  0x4d   : > { %746 = vmatmul.mubr.bf16.gmra.mxu0 %v1808_v30  ;;  %810 = vmatmul.mubr.bf16.gmra.mxu1 %v1809_v31 }
  0x4e   : > { %753 = vmatprep.mubr.bf16.mxu0 %v1810_v32  ;;  %817 = vmatprep.mubr.bf16.mxu1 %v1812_v33 }
  0x55   : > { %754 = vmatmul.mubr.bf16.gmra.mxu0 %v1814_v34  ;;  %818 = vmatmul.mubr.bf16.gmra.mxu1 %v1815_v35 }
  0x56   : > { %761 = vmatprep.mubr.bf16.mxu0 %v1816_v36  ;;  %825 = vmatprep.mubr.bf16.mxu1 %v1818_v37 }
  0x5d   : > { %762 = vmatmul.mubr.bf16.gmra.mxu0 %v1820_v38  ;;  %826 = vmatmul.mubr.bf16.gmra.mxu1 %v1821_v39 }
  0x5e   : > { %769 = vmatprep.mubr.bf16.mxu0 %v1822_v40  ;;  %833 = vmatprep.mubr.bf16.mxu1 %v1824_v41 }
  0x65   : > { %770 = vmatmul.mubr.bf16.gmra.mxu0 %v1826_v42  ;;  %834 = vmatmul.mubr.bf16.gmra.mxu1 %v1827_v43 }
  0x66   : > { %777 = vmatprep.mubr.bf16.mxu0 %v1828_v44  ;;  %841 = vmatprep.mubr.bf16.mxu1 %v1830_v45 }
  0x6d   : > { %778 = vmatmul.mubr.bf16.gmra.mxu0 %v1832_v46  ;;  %842 = vmatmul.mubr.bf16.gmra.mxu1 %v1833_v47 }
  0xf5   : > { %v1601_v48 = vpop.f32.mrf.mxu0  ;;  %v1649_v49 = vpop.f32.mrf.mxu1 }
  0xf7   : > { %v1602_v50 = vpop.f32.mrf.mxu0  ;;  %v1650_v52 = vpop.f32.mrf.mxu1 }
  0xf8   : > { %v1603_v53 = vadd.f32 %v1602_v50, %v1601_v48  ;;  %v1651_v54 = vadd.f32 %v1650_v52, %v1649_v49 }
  0xf9   : > { %v1604_v55 = vpop.f32.mrf.mxu0  ;;  %v1652_v56 = vpop.f32.mrf.mxu1 }
  0xfa   : > { %v956_v57 = vmul.f32 %v1603_v53, %v2084_v51  ;;  %v972_v58 = vmul.f32 %v1651_v54, %v2084_v51 }
  0xfb   : > { %v1605_v60 = vpop.f32.mrf.mxu0  ;;  %v1653_v61 = vpop.f32.mrf.mxu1 }
  0xfc   : > { %v1606_v62 = vadd.f32 %v1605_v60, %v1604_v55  ;;  %v1654_v63 = vadd.f32 %v1653_v61, %v1652_v56  ;;  %v995_v2 = vadd.f32 %v2091_v59, %v956_v57  ;;  %v1011_v3 = vadd.f32 %v2091_v59, %v972_v58 }
  0xfd   : > { %v1607_v0 = vpop.f32.mrf.mxu0  ;;  %v1655_v1 = vpop.f32.mrf.mxu1 }
  0xfe   : > { %v957_v4 = vmul.f32 %v1606_v62, %v2084_v51  ;;  %v973_v5 = vmul.f32 %v1654_v63, %v2084_v51  ;;  %v1027_v14 = vmax.f32 %v995_v2, 0.0  ;;  %v1043_v15 = vmax.f32 %v1011_v3, 0.0 }
  0xff   : > { %v1608_v6 = vpop.f32.mrf.mxu0  ;;  %v1656_v7 = vpop.f32.mrf.mxu1 }
 0x100   : > { %v996_v8 = vadd.f32 %v2091_v59, %v957_v4  ;;  %v1012_v9 = vadd.f32 %v2091_v59, %v973_v5  ;;  %v1609_v10 = vadd.f32 %v1608_v6, %v1607_v0  ;;  %v1657_v11 = vadd.f32 %v1656_v7, %v1655_v1 }
 0x101   : > { %v1610_v12 = vpop.f32.mrf.mxu0  ;;  %v1658_v13 = vpop.f32.mrf.mxu1 }
 0x102   : > { %v1028_v16 = vmax.f32 %v996_v8, 0.0  ;;  %v1044_v17 = vmax.f32 %v1012_v9, 0.0  ;;  %v958_v18 = vmul.f32 %v1609_v10, %v2084_v51  ;;  %v974_v19 = vmul.f32 %v1657_v11, %v2084_v51 }
 0x103   : > { %v1611_v20 = vpop.f32.mrf.mxu0  ;;  %v1659_v21 = vpop.f32.mrf.mxu1 }
 0x104   : > { %v1493_v22 = vpack.c.bf16 %v1028_v16, %v1027_v14  ;;  %v1533_v23 = vpack.c.bf16 %v1044_v17, %v1043_v15  ;;  %v1612_v24 = vadd.f32 %v1611_v20, %v1610_v12  ;;  %v1660_v25 = vadd.f32 %v1659_v21, %v1658_v13 }
 0x105   : > { %v1613_v26 = vpop.f32.mrf.mxu0  ;;  %v1661_v27 = vpop.f32.mrf.mxu1  ;;  %v997_v28 = vadd.f32 %v2091_v59, %v958_v18  ;;  %v1013_v29 = vadd.f32 %v2091_v59, %v974_v19 }
 0x106   : > { %1494 = vst [vmem:[%s2104_s14] sm:$0xff] %v1493_v22   ;;  %1577 = vst [vmem:[%s2104_s14 + $0x40] sm:$0xff] %v1533_v23   ;;  %v959_v30 = vmul.f32 %v1612_v24, %v2084_v51  ;;  %v975_v31 = vmul.f32 %v1660_v25, %v2084_v51 }
 0x107   : > { %v1614_v32 = vpop.f32.mrf.mxu0  ;;  %v1662_v33 = vpop.f32.mrf.mxu1  ;;  %v1029_v42 = vmax.f32 %v997_v28, 0.0  ;;  %v1045_v43 = vmax.f32 %v1013_v29, 0.0 }
 0x108   : > { %v1615_v34 = vadd.f32 %v1614_v32, %v1613_v26  ;;  %v1663_v35 = vadd.f32 %v1662_v33, %v1661_v27  ;;  %v998_v36 = vadd.f32 %v2091_v59, %v959_v30  ;;  %v1014_v37 = vadd.f32 %v2091_v59, %v975_v31 }
 0x109   : > { %v1616_v38 = vpop.f32.mrf.mxu0  ;;  %v1664_v39 = vpop.f32.mrf.mxu1 }
 0x10a   : > { %v960_v40 = vmul.f32 %v1615_v34, %v2084_v51  ;;  %v976_v41 = vmul.f32 %v1663_v35, %v2084_v51  ;;  %v1030_v44 = vmax.f32 %v998_v36, 0.0  ;;  %v1046_v45 = vmax.f32 %v1014_v37, 0.0 }
 0x10b   : > { %v1617_v46 = vpop.f32.mrf.mxu0  ;;  %v1665_v47 = vpop.f32.mrf.mxu1 }
 0x10c   : > { %v1618_v48 = vadd.f32 %v1617_v46, %v1616_v38  ;;  %v1666_v49 = vadd.f32 %v1665_v47, %v1664_v39  ;;  %v1498_v50 = vpack.c.bf16 %v1030_v44, %v1029_v42  ;;  %v1538_v52 = vpack.c.bf16 %v1046_v45, %v1045_v43 }
 0x10d   : > { %v1619_v53 = vpop.f32.mrf.mxu0  ;;  %v1667_v54 = vpop.f32.mrf.mxu1  ;;  %v999_v55 = vadd.f32 %v2091_v59, %v960_v40  ;;  %v1015_v56 = vadd.f32 %v2091_v59, %v976_v41 }
 0x10e   : > { %v961_v57 = vmul.f32 %v1618_v48, %v2084_v51  ;;  %v977_v58 = vmul.f32 %v1666_v49, %v2084_v51  ;;  %1570 = vst [vmem:[%s2104_s14 + $0x8] sm:$0xff] %v1498_v50   ;;  %1578 = vst [vmem:[%s2104_s14 + $0x48] sm:$0xff] %v1538_v52  }
 0x10f   : > { %v1620_v60 = vpop.f32.mrf.mxu0  ;;  %v1668_v61 = vpop.f32.mrf.mxu1  ;;  %v1031_v4 = vmax.f32 %v999_v55, 0.0  ;;  %v1047_v5 = vmax.f32 %v1015_v56, 0.0 }
 0x110   : > { %v1000_v62 = vadd.f32 %v2091_v59, %v961_v57  ;;  %v1016_v63 = vadd.f32 %v2091_v59, %v977_v58  ;;  %v1621_v0 = vadd.f32 %v1620_v60, %v1619_v53  ;;  %v1669_v1 = vadd.f32 %v1668_v61, %v1667_v54 }
 0x111   : > { %v1622_v2 = vpop.f32.mrf.mxu0  ;;  %v1670_v3 = vpop.f32.mrf.mxu1 }
 0x112   : > { %v1032_v6 = vmax.f32 %v1000_v62, 0.0  ;;  %v1048_v7 = vmax.f32 %v1016_v63, 0.0  ;;  %v962_v8 = vmul.f32 %v1621_v0, %v2084_v51  ;;  %v978_v9 = vmul.f32 %v1669_v1, %v2084_v51 }
 0x113   : > { %v1623_v10 = vpop.f32.mrf.mxu0  ;;  %v1671_v11 = vpop.f32.mrf.mxu1 }
 0x114   : > { %v1503_v12 = vpack.c.bf16 %v1032_v6, %v1031_v4  ;;  %v1543_v13 = vpack.c.bf16 %v1048_v7, %v1047_v5  ;;  %v1624_v14 = vadd.f32 %v1623_v10, %v1622_v2  ;;  %v1672_v15 = vadd.f32 %v1671_v11, %v1670_v3 }
 0x115   : > { %v1625_v16 = vpop.f32.mrf.mxu0  ;;  %v1673_v17 = vpop.f32.mrf.mxu1  ;;  %v1001_v18 = vadd.f32 %v2091_v59, %v962_v8  ;;  %v1017_v19 = vadd.f32 %v2091_v59, %v978_v9 }
 0x116   : > { %1571 = vst [vmem:[%s2104_s14 + $0x10] sm:$0xff] %v1503_v12   ;;  %1579 = vst [vmem:[%s2104_s14 + $0x50] sm:$0xff] %v1543_v13   ;;  %v963_v20 = vmul.f32 %v1624_v14, %v2084_v51  ;;  %v979_v21 = vmul.f32 %v1672_v15, %v2084_v51 }
 0x117   : > { %v1626_v22 = vpop.f32.mrf.mxu0  ;;  %v1674_v23 = vpop.f32.mrf.mxu1  ;;  %v1033_v32 = vmax.f32 %v1001_v18, 0.0  ;;  %v1049_v33 = vmax.f32 %v1017_v19, 0.0 }
 0x118   : > { %v1627_v24 = vadd.f32 %v1626_v22, %v1625_v16  ;;  %v1675_v25 = vadd.f32 %v1674_v23, %v1673_v17  ;;  %v1002_v26 = vadd.f32 %v2091_v59, %v963_v20  ;;  %v1018_v27 = vadd.f32 %v2091_v59, %v979_v21 }
 0x119   : > { %v1628_v28 = vpop.f32.mrf.mxu0  ;;  %v1676_v29 = vpop.f32.mrf.mxu1 }
 0x11a   : > { %v964_v30 = vmul.f32 %v1627_v24, %v2084_v51  ;;  %v980_v31 = vmul.f32 %v1675_v25, %v2084_v51  ;;  %v1034_v34 = vmax.f32 %v1002_v26, 0.0  ;;  %v1050_v35 = vmax.f32 %v1018_v27, 0.0 }
 0x11b   : > { %v1629_v36 = vpop.f32.mrf.mxu0  ;;  %v1677_v37 = vpop.f32.mrf.mxu1 }
 0x11c   : > { %v1630_v38 = vadd.f32 %v1629_v36, %v1628_v28  ;;  %v1678_v39 = vadd.f32 %v1677_v37, %v1676_v29  ;;  %v1508_v40 = vpack.c.bf16 %v1034_v34, %v1033_v32  ;;  %v1548_v41 = vpack.c.bf16 %v1050_v35, %v1049_v33 }
 0x11d   : > { %v1631_v42 = vpop.f32.mrf.mxu0  ;;  %v1679_v43 = vpop.f32.mrf.mxu1  ;;  %v1003_v44 = vadd.f32 %v2091_v59, %v964_v30  ;;  %v1019_v45 = vadd.f32 %v2091_v59, %v980_v31 }
 0x11e   : > { %v965_v46 = vmul.f32 %v1630_v38, %v2084_v51  ;;  %v981_v47 = vmul.f32 %v1678_v39, %v2084_v51  ;;  %1572 = vst [vmem:[%s2104_s14 + $0x18] sm:$0xff] %v1508_v40   ;;  %1580 = vst [vmem:[%s2104_s14 + $0x58] sm:$0xff] %v1548_v41  }
 0x11f   : > { %v1632_v48 = vpop.f32.mrf.mxu0  ;;  %v1680_v49 = vpop.f32.mrf.mxu1  ;;  %v1035_v57 = vmax.f32 %v1003_v44, 0.0  ;;  %v1051_v58 = vmax.f32 %v1019_v45, 0.0 }
 0x120   : > { %v1004_v50 = vadd.f32 %v2091_v59, %v965_v46  ;;  %v1020_v52 = vadd.f32 %v2091_v59, %v981_v47  ;;  %v1633_v53 = vadd.f32 %v1632_v48, %v1631_v42  ;;  %v1681_v54 = vadd.f32 %v1680_v49, %v1679_v43 }
 0x121   : > { %v1634_v55 = vpop.f32.mrf.mxu0  ;;  %v1682_v56 = vpop.f32.mrf.mxu1 }
 0x122   : > { %v1036_v60 = vmax.f32 %v1004_v50, 0.0  ;;  %v1052_v61 = vmax.f32 %v1020_v52, 0.0  ;;  %v966_v62 = vmul.f32 %v1633_v53, %v2084_v51  ;;  %v982_v63 = vmul.f32 %v1681_v54, %v2084_v51 }
 0x123   : > { %v1635_v0 = vpop.f32.mrf.mxu0  ;;  %v1683_v1 = vpop.f32.mrf.mxu1 }
 0x124   : > { %v1513_v2 = vpack.c.bf16 %v1036_v60, %v1035_v57  ;;  %v1553_v3 = vpack.c.bf16 %v1052_v61, %v1051_v58  ;;  %v1636_v4 = vadd.f32 %v1635_v0, %v1634_v55  ;;  %v1684_v5 = vadd.f32 %v1683_v1, %v1682_v56 }
 0x125   : > { %v1637_v6 = vpop.f32.mrf.mxu0  ;;  %v1685_v7 = vpop.f32.mrf.mxu1  ;;  %v1005_v8 = vadd.f32 %v2091_v59, %v966_v62  ;;  %v1021_v9 = vadd.f32 %v2091_v59, %v982_v63 }
 0x126   : > { %1573 = vst [vmem:[%s2104_s14 + $0x20] sm:$0xff] %v1513_v2   ;;  %1581 = vst [vmem:[%s2104_s14 + $0x60] sm:$0xff] %v1553_v3   ;;  %v967_v10 = vmul.f32 %v1636_v4, %v2084_v51  ;;  %v983_v11 = vmul.f32 %v1684_v5, %v2084_v51 }
 0x127   : > { %v1638_v12 = vpop.f32.mrf.mxu0  ;;  %v1686_v13 = vpop.f32.mrf.mxu1  ;;  %v1037_v22 = vmax.f32 %v1005_v8, 0.0  ;;  %v1053_v23 = vmax.f32 %v1021_v9, 0.0 }
 0x128   : > { %v1639_v14 = vadd.f32 %v1638_v12, %v1637_v6  ;;  %v1687_v15 = vadd.f32 %v1686_v13, %v1685_v7  ;;  %v1006_v16 = vadd.f32 %v2091_v59, %v967_v10  ;;  %v1022_v17 = vadd.f32 %v2091_v59, %v983_v11 }
 0x129   : > { %v1640_v18 = vpop.f32.mrf.mxu0  ;;  %v1688_v19 = vpop.f32.mrf.mxu1 }
 0x12a   : > { %v968_v20 = vmul.f32 %v1639_v14, %v2084_v51  ;;  %v984_v21 = vmul.f32 %v1687_v15, %v2084_v51  ;;  %v1038_v24 = vmax.f32 %v1006_v16, 0.0  ;;  %v1054_v25 = vmax.f32 %v1022_v17, 0.0 }
 0x12b   : > { %v1641_v26 = vpop.f32.mrf.mxu0  ;;  %v1689_v27 = vpop.f32.mrf.mxu1 }
 0x12c   : > { %v1642_v28 = vadd.f32 %v1641_v26, %v1640_v18  ;;  %v1690_v29 = vadd.f32 %v1689_v27, %v1688_v19  ;;  %v1518_v30 = vpack.c.bf16 %v1038_v24, %v1037_v22  ;;  %v1558_v31 = vpack.c.bf16 %v1054_v25, %v1053_v23 }
 0x12d   : > { %v1643_v32 = vpop.f32.mrf.mxu0  ;;  %v1691_v33 = vpop.f32.mrf.mxu1  ;;  %v1007_v34 = vadd.f32 %v2091_v59, %v968_v20  ;;  %v1023_v35 = vadd.f32 %v2091_v59, %v984_v21 }
 0x12e   : > { %v969_v36 = vmul.f32 %v1642_v28, %v2084_v51  ;;  %v985_v37 = vmul.f32 %v1690_v29, %v2084_v51  ;;  %1574 = vst [vmem:[%s2104_s14 + $0x28] sm:$0xff] %v1518_v30   ;;  %1582 = vst [vmem:[%s2104_s14 + $0x68] sm:$0xff] %v1558_v31  }
 0x12f   : > { %v1644_v38 = vpop.f32.mrf.mxu0  ;;  %v1692_v39 = vpop.f32.mrf.mxu1  ;;  %v1039_v46 = vmax.f32 %v1007_v34, 0.0  ;;  %v1055_v47 = vmax.f32 %v1023_v35, 0.0 }
 0x130   : > { %v1008_v40 = vadd.f32 %v2091_v59, %v969_v36  ;;  %v1024_v41 = vadd.f32 %v2091_v59, %v985_v37  ;;  %v1645_v42 = vadd.f32 %v1644_v38, %v1643_v32  ;;  %v1693_v43 = vadd.f32 %v1692_v39, %v1691_v33 }
 0x131   : > { %v1646_v44 = vpop.f32.mrf.mxu0  ;;  %v1694_v45 = vpop.f32.mrf.mxu1 }
 0x132   : > { %v1040_v48 = vmax.f32 %v1008_v40, 0.0  ;;  %v1056_v49 = vmax.f32 %v1024_v41, 0.0  ;;  %v970_v50 = vmul.f32 %v1645_v42, %v2084_v51  ;;  %v986_v52 = vmul.f32 %v1693_v43, %v2084_v51 }
 0x133   : > { %v1647_v53 = vpop.f32.mrf.mxu0  ;;  %v1695_v54 = vpop.f32.mrf.mxu1 }
 0x134   : > { %v1523_v55 = vpack.c.bf16 %v1040_v48, %v1039_v46  ;;  %v1563_v56 = vpack.c.bf16 %v1056_v49, %v1055_v47  ;;  %v1648_v57 = vadd.f32 %v1647_v53, %v1646_v44  ;;  %v1696_v58 = vadd.f32 %v1695_v54, %v1694_v45 }
 0x135   : > { %v1009_v60 = vadd.f32 %v2091_v59, %v970_v50  ;;  %v1025_v61 = vadd.f32 %v2091_v59, %v986_v52 }
 0x136   : > { %1575 = vst [vmem:[%s2104_s14 + $0x30] sm:$0xff] %v1523_v55   ;;  %1583 = vst [vmem:[%s2104_s14 + $0x70] sm:$0xff] %v1563_v56   ;;  %v971_v62 = vmul.f32 %v1648_v57, %v2084_v51  ;;  %v987_v63 = vmul.f32 %v1696_v58, %v2084_v51 }
 0x137   : > { %v1041_v2 = vmax.f32 %v1009_v60, 0.0  ;;  %v1057_v3 = vmax.f32 %v1025_v61, 0.0 }
 0x138   : > { %v1010_v0 = vadd.f32 %v2091_v59, %v971_v62  ;;  %v1026_v1 = vadd.f32 %v2091_v59, %v987_v63 }
 0x13a   : > { %v1042_v4 = vmax.f32 %v1010_v0, 0.0  ;;  %v1058_v5 = vmax.f32 %v1026_v1, 0.0 }
 0x13c   : > { %v1528_v51 = vpack.c.bf16 %v1042_v4, %v1041_v2  ;;  %v1568_v6 = vpack.c.bf16 %v1058_v5, %v1057_v3 }
 0x13e   : > { %1576 = vst [vmem:[%s2104_s14 + $0x38] sm:$0xff] %v1528_v51   ;;  %1584 = vst [vmem:[%s2104_s14 + $0x78] sm:$0xff] %v1568_v6  }
 0x13f   : > { %1847 = shalt.err (!%p1844_p5)
}
 0x140   : > { %s1848_s9 = scalar_lea.hbm %s2179_s29, 2048  ;;  %s1852_s12 = scalar_lea.hbm %s2236_s4, 16384 }
 0x141   : > { %p1849_p6 = scmp.ne.s32.totalorder %s2179_s29, %s1848_s9  ;;  %p1853_p10 = scmp.lt.s32.totalorder %s2179_s29, %s2236_s4 }
 0x142   : > { %p1854_p11 = scmp.lt.s32.totalorder %s1852_s12, %s1848_s9 }
 0x143   : > { %p1850_p7 = pnand %p1849_p6, %p1980_p4 }
 0x144   : > { %p1855_p12 = por %p1854_p11, %p1853_p10 }
 0x145   : > { %p1851_p9 = pneg %p1850_p7 }
 0x147   : > { %p1856_p13 = pnand %p1855_p12, %p1851_p9 }
 0x149   : > { %1859 = shalt.err (!%p1856_p13)
}
 0x14a   : > { %s1913_s14 = smov 64   ;;  %s1914_s21 = smov 4  }
 0x14b   : > { %1713 = dma.vmem_to_hbm [thread:$0]  (%p1980_p4), %s2181_s22, 2048, %s2179_s29, %s2187_s18, %s1913_s14, %s1913_s14, %s1914_s21  }
 0x14c PF: > { %p1719_p0 = scmp.ge.s32.totalorder %s1910_s20, 2  ;;  %s1249_s24 = sand.u32 1, %s1890_s15  }
 0x14d   : > { %s1250_s26 = scalar_lea.sflag [#allocation4], %s1249_s24 }
 0x14e   : > { %p1716_p1 = pnand %p1719_p0, %p1987_p8 }
 0x150   : > { %p1717_p2 = pneg %p1716_p1 }
 0x152   : > { %1885 = dma.done.wait (%p1717_p2), %s1250_s26, 2048  }
 0x153   : > { %1887 = vsyncadd (%p1717_p2), %s1250_s26, 4294965248  ;;  %s17_s20 = sadd.s32 1, %s1910_s20   ;;  %s2239_s15 = smov %s1894_s16 }
 0x154   : > { %p14_p3 = scmp.ge.s32.totalorder %s17_s20, 10   ;;  %s2240_s16 = smov %s1898_s17 }
 0x155   : > { %s2241_s17 = smov %s1993_s28  ;;  %s2242_s18 = smov %s1906_s19 }
 0x156   : > { %s2243_s19 = smov %s2245_s23  ;;  %16 = sbr.rel (!%p14_p3) target bundleno = 4 (0x4), region = 88 }
 0x15b   :  { %1255 = vsyncpa [#allocation4], 1 }
 0x15c   :  { %1257 = vsyncpa [#allocation4 + $0x1], 1 }

</bundles_post_ra>
